<compile_context>
chip_gen: v6e
topology: v6e:2x2x1
jax: 0.10.0
libtpu: 0.0.40
codegen_flags: <defaults>
</compile_context>

<pallas_src>
import functools

import jax
import jax.numpy as jnp
from jax.experimental import pallas as pl
from jax.experimental.pallas import tpu as pltpu

_MAX_TB = 8     # sets per grid step (sublane-friendly output blocks)
_MAX_TN = 512   # set elements per grid step (multiple of 8; keeps x tiles small)


def _round_up(x, m):
    return (x + m - 1) // m * m


def _integrated_kernel(x_ref, phi_w_ref, phi_b_ref,
                       rho_w_ref, rho_b_ref,
                       enc_w_ref, enc_b_ref,
                       dec_w_ref, dec_b_ref,
                       y_ref, feat_ref, y2_ref,
                       acc_ref,
                       *, n_elems, tile_n, pool_scale, needs_mask):
    n_idx = pl.program_id(1)

    @pl.when(n_idx == 0)
    def _init():
        acc_ref[...] = jnp.zeros_like(acc_ref)

    # deepsets.phi: per-element Linear + ReLU over this (TB, TN) chunk of elements.
    # bf16 operands, f32 MXU accumulation; bias + ReLU in f32.
    h = jnp.einsum("bnd,dh->bnh", x_ref[...], phi_w_ref[...],
                   preferred_element_type=jnp.float32)            # (TB, TN, H) f32
    h = jnp.maximum(h + phi_b_ref[...][None], 0.0)

    if needs_mask:  # only traced when N % tile_n != 0: zero out-of-range elements
        elem = n_idx * tile_n + jax.lax.broadcasted_iota(jnp.int32, (tile_n, 1), 0)
        h = jnp.where(elem < n_elems, h, 0.0)

    # Permutation-invariant pool: partial sum over this chunk's set axis
    # (XLU sublane reduce), accumulated across N-chunks in a VMEM scratch.
    acc_ref[...] += jnp.sum(h, axis=1)                            # (TB, H) f32

    # Tail (deepsets.rho -> imp_encoder -> imp_decoder) only at the final N-chunk.
    # Tiny (<=8-row) matmuls: kept in f32, negligible FLOPs/bytes.
    @pl.when(n_idx == pl.num_programs(1) - 1)
    def _tail():
        pooled = acc_ref[...] * pool_scale                        # mean (1/N) or sum (1.0)
        y = jnp.maximum(
            jnp.dot(pooled, rho_w_ref[...],
                    preferred_element_type=jnp.float32) + rho_b_ref[...], 0.0)
        feat = jnp.maximum(
            jnp.dot(y, enc_w_ref[...],
                    preferred_element_type=jnp.float32) + enc_b_ref[...], 0.0)
        y2 = (jnp.dot(feat, dec_w_ref[...],
                      preferred_element_type=jnp.float32) + dec_b_ref[...])
        y_ref[...] = y
        feat_ref[...] = feat
        y2_ref[...] = y2


def integrated_forward(inputs, params):
    """inputs: list of (N, D) arrays (same N, D) — mirrors the torch list-of-sets."""
    # Mirror the torch control flow (static at trace time):
    #   len(inputs) != 1            -> deepsets(x, True)   (mean pool)
    #   len(inputs) == 1, len==300  -> deepsets(x, False)  (sum pool)
    #   else                        -> deepsets(x, True)
    use_mean = not (len(inputs) == 1 and inputs[0].shape[0] == 300)
    # TODO(synk): .to('cuda') transfer has no Pallas equivalent (data already on device).
    # NOTE: all sets must share (N, D); ragged sets would need padding + masked pooling.

    x = jnp.stack(inputs, axis=0)                                 # (B, N, D)
    B, N, D = x.shape
    H = params["phi_w"].shape[1]
    L = params["rho_w"].shape[1]
    E = params["enc_w"].shape[1]

    # bf16 for the dominant HBM traffic (x + phi weights); tail weights/biases stay f32.
    x_bf = x.astype(jnp.bfloat16)
    phi_w = params["phi_w"].astype(jnp.bfloat16)
    phi_b = params["phi_b"].astype(jnp.float32)
    rho_w = params["rho_w"].astype(jnp.float32)
    rho_b = params["rho_b"].astype(jnp.float32)
    enc_w = params["enc_w"].astype(jnp.float32)
    enc_b = params["enc_b"].astype(jnp.float32)
    dec_w = params["dec_w"].astype(jnp.float32)
    dec_b = params["dec_b"].astype(jnp.float32)

    # Tiling: B in tiles of <=8 sets, N in chunks of <=512 elements; N (reduction) last.
    TB = B if B <= _MAX_TB else _MAX_TB
    Bp = _round_up(B, TB)
    if Bp != B:  # only when B > 8 and not a multiple of 8; cheap (B axis only)
        x_bf = jnp.pad(x_bf, ((0, Bp - B), (0, 0), (0, 0)))
    grid_b = Bp // TB

    TN = N if N <= _MAX_TN else _MAX_TN
    grid_n = pl.cdiv(N, TN)
    needs_mask = (N % TN) != 0

    pool_scale = (1.0 / N) if use_mean else 1.0

    kernel = functools.partial(_integrated_kernel, n_elems=N, tile_n=TN,
                               pool_scale=pool_scale, needs_mask=needs_mask)

    def _resident(shape):  # weights/biases stay resident in VMEM across the grid
        return pl.BlockSpec(shape, lambda b, n: (0, 0))

    y_p, feat_p, y2_p = pl.pallas_call(
        kernel,
        out_shape=(jax.ShapeDtypeStruct((Bp, L), jnp.float32),   # output (stacked deepsets)
                   jax.ShapeDtypeStruct((Bp, E), jnp.float32),   # imp_feature
                   jax.ShapeDtypeStruct((Bp, L), jnp.float32)),  # output2 (decoded)
        grid_spec=pltpu.PrefetchScalarGridSpec(
            num_scalar_prefetch=0,
            grid=(grid_b, grid_n),                               # reduction (N) axis last
            in_specs=[
                pl.BlockSpec((TB, TN, D), lambda b, n: (b, n, 0)),
                _resident(phi_w.shape), _resident(phi_b.shape),
                _resident(rho_w.shape), _resident(rho_b.shape),
                _resident(enc_w.shape), _resident(enc_b.shape),
                _resident(dec_w.shape), _resident(dec_b.shape),
            ],
            out_specs=(pl.BlockSpec((TB, L), lambda b, n: (b, 0)),
                       pl.BlockSpec((TB, E), lambda b, n: (b, 0)),
                       pl.BlockSpec((TB, L), lambda b, n: (b, 0))),
            scratch_shapes=[pltpu.VMEM((TB, H), jnp.float32)]),
        compiler_params=pltpu.CompilerParams(
            dimension_semantics=("parallel", "arbitrary"),       # B shards across v7x's 2 TCs
            vmem_limit_bytes=32 * 1024 * 1024),
    )(x_bf, phi_w, phi_b, rho_w, rho_b, enc_w, enc_b, dec_w, dec_b)

    if Bp != B:
        return y_p[:B], feat_p[:B], y2_p[:B]
    return y_p, feat_p, y2_p


def _reference(inputs, params, use_mean):
    outs = []
    for xi in inputs:
        h = jax.nn.relu(xi @ params["phi_w"] + params["phi_b"])
        pooled = (h.mean(0, keepdims=True) if use_mean
                  else h.sum(0, keepdims=True))
        y = jax.nn.relu(pooled @ params["rho_w"] + params["rho_b"])
        outs.append(y[0])
    out = jnp.stack(outs)
    feat = jax.nn.relu(out @ params["enc_w"] + params["enc_b"][0])
    y2 = feat @ params["dec_w"] + params["dec_b"][0]
    return out, feat, y2


if __name__ == "__main__":
    # Small shapes: B=2 sets, N=8 elements/set, D=32 features,
    # H=64 phi hidden, L=32 deepsets embedding, E=16 imp latent.
    B, N, D, H, L, E = 2, 8, 32, 64, 32, 16

    key = jax.random.PRNGKey(0)
    ks = jax.random.split(key, 16)
    params = {
        "phi_w": 0.1 * jax.random.normal(ks[0], (D, H), jnp.float32),
        "phi_b": 0.1 * jax.random.normal(ks[1], (1, H), jnp.float32),
        "rho_w": 0.1 * jax.random.normal(ks[2], (H, L), jnp.float32),
        "rho_b": 0.1 * jax.random.normal(ks[3], (1, L), jnp.float32),
        "enc_w": 0.1 * jax.random.normal(ks[4], (L, E), jnp.float32),
        "enc_b": 0.1 * jax.random.normal(ks[5], (1, E), jnp.float32),
        "dec_w": 0.1 * jax.random.normal(ks[6], (E, L), jnp.float32),
        "dec_b": 0.1 * jax.random.normal(ks[7], (1, L), jnp.float32),
    }

    inputs = [jax.random.normal(ks[8], (N, D), jnp.float32),
              jax.random.normal(ks[9], (N, D), jnp.float32)]

    out, feat, out2 = integrated_forward(inputs, params)
    jax.block_until_ready((out, feat, out2))

    ref_out, ref_feat, ref_out2 = _reference(inputs, params, use_mean=True)
    # bf16 inputs with f32 accumulation -> loosened tolerances vs the f32 reference.
    assert jnp.allclose(out, ref_out, atol=2e-2, rtol=2e-2)
    assert jnp.allclose(feat, ref_feat, atol=2e-2, rtol=2e-2)
    assert jnp.allclose(out2, ref_out2, atol=2e-2, rtol=2e-2)
    assert out.shape == (B, L) and feat.shape == (B, E) and out2.shape == (B, L)

    print("KERNEL_OK")
</pallas_src>

<mosaic_0001>
module attributes {stable_mosaic.version = 11 : i64} {
  func.func @_integrated_kernel(%arg0: i32, %arg1: i32, %arg2: memref<2x8x32xbf16, #tpu.memory_space<vmem>>, %arg3: memref<32x64xbf16, #tpu.memory_space<vmem>>, %arg4: memref<1x64xf32, #tpu.memory_space<vmem>>, %arg5: memref<64x32xf32, #tpu.memory_space<vmem>>, %arg6: memref<1x32xf32, #tpu.memory_space<vmem>>, %arg7: memref<32x16xf32, #tpu.memory_space<vmem>>, %arg8: memref<1x16xf32, #tpu.memory_space<vmem>>, %arg9: memref<16x32xf32, #tpu.memory_space<vmem>>, %arg10: memref<1x32xf32, #tpu.memory_space<vmem>>, %arg11: memref<2x32xf32, #tpu.memory_space<vmem>>, %arg12: memref<2x16xf32, #tpu.memory_space<vmem>>, %arg13: memref<2x32xf32, #tpu.memory_space<vmem>>, %arg14: memref<2x64xf32, #tpu.memory_space<vmem>>) attributes {dimension_semantics = [#tpu.dimension_semantics<parallel>, #tpu.dimension_semantics<arbitrary>], iteration_bounds = array<i64: 1, 1>, scalar_prefetch = 0 : i64, scratch_operands = 1 : i64, tpu.core_type = #tpu.core_type<tc>, window_params = [{transform_indices = @transform_0, window_bounds = array<i64: 2, 8, 32>}, {pipeline_mode = #tpu.pipeline_mode<synchronous>, transform_indices = @transform_1, window_bounds = array<i64: 32, 64>}, {pipeline_mode = #tpu.pipeline_mode<synchronous>, transform_indices = @transform_2, window_bounds = array<i64: 1, 64>}, {pipeline_mode = #tpu.pipeline_mode<synchronous>, transform_indices = @transform_3, window_bounds = array<i64: 64, 32>}, {pipeline_mode = #tpu.pipeline_mode<synchronous>, transform_indices = @transform_4, window_bounds = array<i64: 1, 32>}, {pipeline_mode = #tpu.pipeline_mode<synchronous>, transform_indices = @transform_5, window_bounds = array<i64: 32, 16>}, {pipeline_mode = #tpu.pipeline_mode<synchronous>, transform_indices = @transform_6, window_bounds = array<i64: 1, 16>}, {pipeline_mode = #tpu.pipeline_mode<synchronous>, transform_indices = @transform_7, window_bounds = array<i64: 16, 32>}, {pipeline_mode = #tpu.pipeline_mode<synchronous>, transform_indices = @transform_8, window_bounds = array<i64: 1, 32>}, {transform_indices = @transform_9, window_bounds = array<i64: 2, 32>}, {transform_indices = @transform_10, window_bounds = array<i64: 2, 16>}, {transform_indices = @transform_11, window_bounds = array<i64: 2, 32>}]} {
    %c0_i32 = arith.constant 0 : i32
    %0 = arith.cmpi eq, %arg1, %c0_i32 : i32
    %1 = arith.extui %0 : i1 to i32
    %c0_i32_0 = arith.constant 0 : i32
    %2 = arith.cmpi ne, %1, %c0_i32_0 : i32
    scf.if %2 {
      %cst_15 = arith.constant 0.000000e+00 : f32
      %19 = vector.broadcast %cst_15 : f32 to vector<2x64xf32>
      %c0_16 = arith.constant 0 : index
      %c0_17 = arith.constant 0 : index
      %20 = vector.load %arg14[%c0_16, %c0_17] : memref<2x64xf32, #tpu.memory_space<vmem>>, vector<2x64xf32>
      tpu.vector_store %arg14[%c0_16, %c0_17], %19 {strides = array<i32>} : memref<2x64xf32, #tpu.memory_space<vmem>>, vector<2x64xf32>,
    } else {
    }
    %c0 = arith.constant 0 : index
    %c0_1 = arith.constant 0 : index
    %c0_2 = arith.constant 0 : index
    %3 = vector.load %arg2[%c0, %c0_1, %c0_2] : memref<2x8x32xbf16, #tpu.memory_space<vmem>>, vector<2x8x32xbf16>
    %c0_3 = arith.constant 0 : index
    %c0_4 = arith.constant 0 : index
    %4 = vector.load %arg3[%c0_3, %c0_4] : memref<32x64xbf16, #tpu.memory_space<vmem>>, vector<32x64xbf16>
    "tpu.trace_start"() <{level = 10 : i32, message = "bnd,dh->bnh"}> : () -> ()
    %cst = arith.constant dense<0.000000e+00> : vector<2x8x64xf32>
    %5 = tpu.matmul %3, %4, %cst {dimension_numbers = #tpu.dot_dimension_numbers<[2], [0], [0, 1], [1], [0, 0, 0, 1, 1, 1], [], []>} : vector<2x8x32xbf16>, vector<32x64xbf16>, vector<2x8x64xf32> -> vector<2x8x64xf32>
    "tpu.trace_stop"() : () -> ()
    %c0_5 = arith.constant 0 : index
    %c0_6 = arith.constant 0 : index
    %6 = vector.load %arg4[%c0_5, %c0_6] : memref<1x64xf32, #tpu.memory_space<vmem>>, vector<1x64xf32>
    %7 = vector.shape_cast %6 : vector<1x64xf32> to vector<1x1x64xf32>
    %8 = vector.broadcast %7 : vector<1x1x64xf32> to vector<2x8x64xf32>
    %9 = arith.addf %5, %8 : vector<2x8x64xf32>
    %cst_7 = arith.constant 0.000000e+00 : f32
    %10 = vector.broadcast %cst_7 : f32 to vector<2x8x64xf32>
    %11 = arith.maximumf %9, %10 : vector<2x8x64xf32>
    %c0_8 = arith.constant 0 : index
    %c0_9 = arith.constant 0 : index
    %12 = vector.load %arg14[%c0_8, %c0_9] : memref<2x64xf32, #tpu.memory_space<vmem>>, vector<2x64xf32>
    %cst_10 = arith.constant dense<0.000000e+00> : vector<2x64xf32>
    %13 = vector.multi_reduction <add>, %11, %cst_10 [1] : vector<2x8x64xf32> to vector<2x64xf32>
    %14 = arith.addf %12, %13 : vector<2x64xf32>
    %c0_11 = arith.constant 0 : index
    %c0_12 = arith.constant 0 : index
    %15 = vector.load %arg14[%c0_11, %c0_12] : memref<2x64xf32, #tpu.memory_space<vmem>>, vector<2x64xf32>
    tpu.vector_store %arg14[%c0_11, %c0_12], %14 {strides = array<i32>} : memref<2x64xf32, #tpu.memory_space<vmem>>, vector<2x64xf32>,
    %c0_i32_13 = arith.constant 0 : i32
    %16 = arith.cmpi eq, %arg1, %c0_i32_13 : i32
    %17 = arith.extui %16 : i1 to i32
    %c0_i32_14 = arith.constant 0 : i32
    %18 = arith.cmpi ne, %17, %c0_i32_14 : i32
    scf.if %18 {
      %c0_15 = arith.constant 0 : index
      %c0_16 = arith.constant 0 : index
      %19 = vector.load %arg14[%c0_15, %c0_16] : memref<2x64xf32, #tpu.memory_space<vmem>>, vector<2x64xf32>
      %cst_17 = arith.constant 1.250000e-01 : f32
      %20 = vector.broadcast %cst_17 : f32 to vector<2x64xf32>
      %21 = arith.mulf %19, %20 : vector<2x64xf32>
      %c0_18 = arith.constant 0 : index
      %c0_19 = arith.constant 0 : index
      %22 = vector.load %arg5[%c0_18, %c0_19] : memref<64x32xf32, #tpu.memory_space<vmem>>, vector<64x32xf32>
      %cst_20 = arith.constant dense<0.000000e+00> : vector<2x32xf32>
      %23 = tpu.matmul %21, %22, %cst_20 {dimension_numbers = #tpu.dot_dimension_numbers<[1], [0], [0], [1], [0, 0, 1, 1], [], []>} : vector<2x64xf32>, vector<64x32xf32>, vector<2x32xf32> -> vector<2x32xf32>
      %c0_21 = arith.constant 0 : index
      %c0_22 = arith.constant 0 : index
      %24 = vector.load %arg6[%c0_21, %c0_22] : memref<1x32xf32, #tpu.memory_space<vmem>>, vector<1x32xf32>
      %25 = vector.broadcast %24 : vector<1x32xf32> to vector<2x32xf32>
      %26 = arith.addf %23, %25 : vector<2x32xf32>
      %cst_23 = arith.constant 0.000000e+00 : f32
      %27 = vector.broadcast %cst_23 : f32 to vector<2x32xf32>
      %28 = arith.maximumf %26, %27 : vector<2x32xf32>
      %c0_24 = arith.constant 0 : index
      %c0_25 = arith.constant 0 : index
      %29 = vector.load %arg7[%c0_24, %c0_25] : memref<32x16xf32, #tpu.memory_space<vmem>>, vector<32x16xf32>
      %cst_26 = arith.constant dense<0.000000e+00> : vector<2x16xf32>
      %30 = tpu.matmul %28, %29, %cst_26 {dimension_numbers = #tpu.dot_dimension_numbers<[1], [0], [0], [1], [0, 0, 1, 1], [], []>} : vector<2x32xf32>, vector<32x16xf32>, vector<2x16xf32> -> vector<2x16xf32>
      %c0_27 = arith.constant 0 : index
      %c0_28 = arith.constant 0 : index
      %31 = vector.load %arg8[%c0_27, %c0_28] : memref<1x16xf32, #tpu.memory_space<vmem>>, vector<1x16xf32>
      %32 = vector.broadcast %31 : vector<1x16xf32> to vector<2x16xf32>
      %33 = arith.addf %30, %32 : vector<2x16xf32>
      %cst_29 = arith.constant 0.000000e+00 : f32
      %34 = vector.broadcast %cst_29 : f32 to vector<2x16xf32>
      %35 = arith.maximumf %33, %34 : vector<2x16xf32>
      %c0_30 = arith.constant 0 : index
      %c0_31 = arith.constant 0 : index
      %36 = vector.load %arg9[%c0_30, %c0_31] : memref<16x32xf32, #tpu.memory_space<vmem>>, vector<16x32xf32>
      %cst_32 = arith.constant dense<0.000000e+00> : vector<2x32xf32>
      %37 = tpu.matmul %35, %36, %cst_32 {dimension_numbers = #tpu.dot_dimension_numbers<[1], [0], [0], [1], [0, 0, 1, 1], [], []>} : vector<2x16xf32>, vector<16x32xf32>, vector<2x32xf32> -> vector<2x32xf32>
      %c0_33 = arith.constant 0 : index
      %c0_34 = arith.constant 0 : index
      %38 = vector.load %arg10[%c0_33, %c0_34] : memref<1x32xf32, #tpu.memory_space<vmem>>, vector<1x32xf32>
      %39 = vector.broadcast %38 : vector<1x32xf32> to vector<2x32xf32>
      %40 = arith.addf %37, %39 : vector<2x32xf32>
      %c0_35 = arith.constant 0 : index
      %c0_36 = arith.constant 0 : index
      %41 = vector.load %arg11[%c0_35, %c0_36] : memref<2x32xf32, #tpu.memory_space<vmem>>, vector<2x32xf32>
      tpu.vector_store %arg11[%c0_35, %c0_36], %28 {strides = array<i32>} : memref<2x32xf32, #tpu.memory_space<vmem>>, vector<2x32xf32>,
      %c0_37 = arith.constant 0 : index
      %c0_38 = arith.constant 0 : index
      %42 = vector.load %arg12[%c0_37, %c0_38] : memref<2x16xf32, #tpu.memory_space<vmem>>, vector<2x16xf32>
      tpu.vector_store %arg12[%c0_37, %c0_38], %35 {strides = array<i32>} : memref<2x16xf32, #tpu.memory_space<vmem>>, vector<2x16xf32>,
      %c0_39 = arith.constant 0 : index
      %c0_40 = arith.constant 0 : index
      %43 = vector.load %arg13[%c0_39, %c0_40] : memref<2x32xf32, #tpu.memory_space<vmem>>, vector<2x32xf32>
      tpu.vector_store %arg13[%c0_39, %c0_40], %40 {strides = array<i32>} : memref<2x32xf32, #tpu.memory_space<vmem>>, vector<2x32xf32>,
    } else {
    }
    return
  }
  func.func @transform_0(%arg0: i32, %arg1: i32) -> (i32, i32, i32) {
    %c0_i32 = arith.constant 0 : i32
    %c0_i32_0 = arith.constant 0 : i32
    return %arg0, %arg1, %c0_i32 : i32, i32, i32
  }
  func.func @transform_1(%arg0: i32, %arg1: i32) -> (i32, i32) {
    %c0_i32 = arith.constant 0 : i32
    %c0_i32_0 = arith.constant 0 : i32
    %c0_i32_1 = arith.constant 0 : i32
    return %c0_i32, %c0_i32_0 : i32, i32
  }
  func.func @transform_2(%arg0: i32, %arg1: i32) -> (i32, i32) {
    %c0_i32 = arith.constant 0 : i32
    %c0_i32_0 = arith.constant 0 : i32
    %c0_i32_1 = arith.constant 0 : i32
    return %c0_i32, %c0_i32_0 : i32, i32
  }
  func.func @transform_3(%arg0: i32, %arg1: i32) -> (i32, i32) {
    %c0_i32 = arith.constant 0 : i32
    %c0_i32_0 = arith.constant 0 : i32
    %c0_i32_1 = arith.constant 0 : i32
    return %c0_i32, %c0_i32_0 : i32, i32
  }
  func.func @transform_4(%arg0: i32, %arg1: i32) -> (i32, i32) {
    %c0_i32 = arith.constant 0 : i32
    %c0_i32_0 = arith.constant 0 : i32
    %c0_i32_1 = arith.constant 0 : i32
    return %c0_i32, %c0_i32_0 : i32, i32
  }
  func.func @transform_5(%arg0: i32, %arg1: i32) -> (i32, i32) {
    %c0_i32 = arith.constant 0 : i32
    %c0_i32_0 = arith.constant 0 : i32
    %c0_i32_1 = arith.constant 0 : i32
    return %c0_i32, %c0_i32_0 : i32, i32
  }
  func.func @transform_6(%arg0: i32, %arg1: i32) -> (i32, i32) {
    %c0_i32 = arith.constant 0 : i32
    %c0_i32_0 = arith.constant 0 : i32
    %c0_i32_1 = arith.constant 0 : i32
    return %c0_i32, %c0_i32_0 : i32, i32
  }
  func.func @transform_7(%arg0: i32, %arg1: i32) -> (i32, i32) {
    %c0_i32 = arith.constant 0 : i32
    %c0_i32_0 = arith.constant 0 : i32
    %c0_i32_1 = arith.constant 0 : i32
    return %c0_i32, %c0_i32_0 : i32, i32
  }
  func.func @transform_8(%arg0: i32, %arg1: i32) -> (i32, i32) {
    %c0_i32 = arith.constant 0 : i32
    %c0_i32_0 = arith.constant 0 : i32
    %c0_i32_1 = arith.constant 0 : i32
    return %c0_i32, %c0_i32_0 : i32, i32
  }
  func.func @transform_9(%arg0: i32, %arg1: i32) -> (i32, i32) {
    %c0_i32 = arith.constant 0 : i32
    %c0_i32_0 = arith.constant 0 : i32
    return %arg0, %c0_i32 : i32, i32
  }
  func.func @transform_10(%arg0: i32, %arg1: i32) -> (i32, i32) {
    %c0_i32 = arith.constant 0 : i32
    %c0_i32_0 = arith.constant 0 : i32
    return %arg0, %c0_i32 : i32, i32
  }
  func.func @transform_11(%arg0: i32, %arg1: i32) -> (i32, i32) {
    %c0_i32 = arith.constant 0 : i32
    %c0_i32_0 = arith.constant 0 : i32
    return %arg0, %c0_i32 : i32, i32
  }
}

</mosaic_0001>

<bundles_post_ra>
// kernel: tpu_custom_call.1
= control target key start
LH: loop header
LB: loop body
LE: loop exit
PB: predicated region body
PF: predicated region fallthrough
CT: control target
= control target key end

     0   :  { %17 = vsyncpa [#allocation4], 0  ;;  %v601_v1 = vmov 0.0   ;;  %vm602_vm0 = vmmov 0   ;;  %s772_s0 = inlined_call_operand.vmem [shape: bf16[2,8,32], index: 0, kind: input, shape index: {}]   ;;  %s773_s1 = inlined_call_operand.vmem [shape: bf16[32,64], index: 1, kind: input, shape index: {}]   ;;  %s774_s2 = inlined_call_operand.vmem [shape: f32[1,64], index: 2, kind: input, shape index: {}]   ;;  %s775_s3 = inlined_call_operand.vmem [shape: f32[64,32], index: 3, kind: input, shape index: {}]   ;;  %s776_s4 = inlined_call_operand.vmem [shape: f32[1,32], index: 4, kind: input, shape index: {}]   ;;  %s777_s5 = inlined_call_operand.vmem [shape: f32[32,16], index: 5, kind: input, shape index: {}]   ;;  %s778_s6 = inlined_call_operand.vmem [shape: f32[1,16], index: 6, kind: input, shape index: {}]   ;;  %s779_s7 = inlined_call_operand.vmem [shape: f32[16,32], index: 7, kind: input, shape index: {}]   ;;  %s780_s8 = inlined_call_operand.vmem [shape: f32[1,32], index: 8, kind: input, shape index: {}]   ;;  %s781_s9 = inlined_call_operand.hbm [shape: f32[2,32], index: 9, kind: output, shape index: {0}]   ;;  %s782_s10 = inlined_call_operand.hbm [shape: f32[2,16], index: 10, kind: output, shape index: {1}]   ;;  %s783_s11 = inlined_call_operand.hbm [shape: f32[2,32], index: 11, kind: output, shape index: {2}]  }
   0x1   :  { %v534_v0 = vld [vmem:[%s773_s1 + $0x8] sm:$0xff]   ;;  %484 = vmatprep.subr.bf16.mxu0 %v601_v1  ;;  %492 = vmatprep.subr.mxu1 %v601_v1  ;;  %v535_v2 = vld [vmem:[%s773_s1] sm:$0xff]  }
   0x2   :  { %485 = vmatpush3.bf16.msra.mxu0 %v534_v0  ;;  %488 = vmatprep.mubr.msk.bf16.mxu0 %vm602_vm0, %v601_v1 }
   0x3   :  { %486 = vmatprep.subr.bf16.mxu0 %v601_v1  ;;  %508 = vmatprep.mubr.msk.f32.mxu1 %vm602_vm0, %v601_v1 }
   0x4   :  { %18 = vsyncpa [#allocation6], 0  ;;  %v536_v3 = vld [vmem:[%s772_s0] sm:$0xff]   ;;  %vm74_vm1 = vcmask 261120   ;;  %vm42_vm2 = vcmask 517120   ;;  %v157_v4 = vld [vmem:[%s775_s3 + $0x38] sm:$0xff] }
   0x5   :  { %43 = vst.msk [vmem:[#allocation2] sm:$0x3] %vm42_vm2, %v601_v1  ;;  %493 = vmatpush3.msra.mxu1 %v157_v4  ;;  %v156_v5 = vld [vmem:[%s775_s3 + $0x30] sm:$0xff]  ;;  %v155_v6 = vld [vmem:[%s775_s3 + $0x28] sm:$0xff]  ;;  %v154_v7 = vld [vmem:[%s775_s3 + $0x20] sm:$0xff]  ;;  %vm122_vm3 = vcmask 523264  }
   0x6   :  { %487 = vmatpush3.bf16.msra.mxu0 %v535_v2  ;;  %494 = vmatprep.subr.mxu1 %v601_v1  ;;  %v153_v8 = vld [vmem:[%s775_s3 + $0x18] sm:$0xff]  ;;  %v152_v9 = vld [vmem:[%s775_s3 + $0x10] sm:$0xff]  ;;  %v151_v10 = vld [vmem:[%s775_s3 + $0x8] sm:$0xff]  ;;  %vm139_vm4 = vcmask 1041409   ;;  %vm407_vm5 = vcmask 254976   ;;  %vm333_vm6 = vcmask 130048  }
   0x7   :  { %511 = vmatprep.subr.mxu0 %v601_v1  ;;  %495 = vmatpush3.msra.mxu1 %v156_v5  ;;  %v150_v11 = vld [vmem:[%s775_s3] sm:$0xff]  ;;  %v242_v12 = vld [vmem:[%s777_s5 + $0x18] sm:$0xff]  ;;  %v241_v13 = vld [vmem:[%s777_s5 + $0x10] sm:$0xff]  ;;  %vm409_vm7 = vcmask 123904   ;;  %s603_s30 = smov [#allocation5]   ;;  %s604_s13 = smov [#allocation3]  }
   0x8   :  { %496 = vmatprep.subr.mxu1 %v601_v1  ;;  %v453_v14 = vld [vmem:[%s774_s2] ss:$0 sm:$0xff]  ;;  %v240_v42 = vld [vmem:[%s777_s5 + $0x8] sm:$0xff]  ;;  %s428_s12 = sshll.u32 %s603_s30, 4  ;;  %s418_s14 = sshll.u32 %s604_s13, 4  ;;  %s429_s12 = int_to_ptr.vmem [resolvable:$true] %s428_s12  ;;  %s419_s14 = int_to_ptr.vmem [resolvable:$true] %s418_s14 }
   0x9   :  { %489 = vmatmul.mubr.msk.bf16.vlgmr.msra.gmra.mxu0 %vm74_vm1, %v536_v3  ;;  %497 = vmatpush3.msra.mxu1 %v155_v6  ;;  %v239_v43 = vld [vmem:[%s777_s5] sm:$0xff]  ;;  %v325_v49 = vld [vmem:[%s779_s7 + $0x8] sm:$0xff]  ;;  %s537_s15 = scalar_lea.vmem %s429_s12, 32  ;;  %p542_p1 = scmp.lt.s32.totalorder %s429_s12, %s429_s12 }
   0xa   :  { %519 = vmatprep.mubr.msk.f32.mxu0 %vm602_vm0, %v601_v1  ;;  %498 = vmatprep.subr.mxu1 %v601_v1  ;;  %v458_v44 = vld [vmem:[%s776_s4] ss:$0 sm:$0xff]  ;;  %p538_p0 = scmp.ne.s32.totalorder %s429_s12, %s537_s15  ;;  %p543_p2 = scmp.lt.s32.totalorder %s537_s15, %s537_s15 }
   0xb   :  { %499 = vmatpush3.msra.mxu1 %v154_v7  ;;  %512 = vmatpush3.msra.mxu0 %v242_v12  ;;  %v324_v50 = vld [vmem:[%s779_s7] sm:$0xff] }
   0xc   :  { %500 = vmatprep.subr.mxu1 %v601_v1  ;;  %513 = vmatprep.subr.mxu0 %v601_v1  ;;  %v121_v36 = vld [vmem:[#allocation2] sm:$0x3]  ;;  %p544_p3 = por %p543_p2, %p542_p1 }
   0xd   :  { %501 = vmatpush3.msra.mxu1 %v153_v8  ;;  %514 = vmatpush3.msra.mxu0 %v241_v13  ;;  %v460_v51 = vld [vmem:[%s778_s6] ss:$0 sm:$0xff] }
   0xe   :  { %502 = vmatprep.subr.mxu1 %v601_v1  ;;  %515 = vmatprep.subr.mxu0 %v601_v1  ;;  %p545_p4 = pnand %p544_p3, %p538_p0 }
   0xf   :  { %503 = vmatpush3.msra.mxu1 %v152_v9  ;;  %516 = vmatpush3.msra.mxu0 %v240_v42 }
  0x10   :  { %504 = vmatprep.subr.mxu1 %v601_v1  ;;  %517 = vmatprep.subr.mxu0 %v601_v1 }
  0x11   :  { %505 = vmatpush3.msra.mxu1 %v151_v10  ;;  %518 = vmatpush3.msra.mxu0 %v239_v43 }
  0x12   :  { %506 = vmatprep.subr.mxu1 %v601_v1  ;;  %522 = vmatprep.subr.mxu0 %v601_v1 }
  0x13   :  { %507 = vmatpush3.msra.mxu1 %v150_v11 }
  0xc9   :  { %v112_v15 = vpop.f32.mrf.mxu0 }
  0xca   :  { %v113_v16 = vadd.f32 %v453_v14, %v112_v15 }
  0xcb   :  { %v490_v17 = vpop.f32.mrf.mxu0 }
  0xcc   :  { %v119_v18 = vmax.f32 %v113_v16, 0.0 }
  0xcd   :  { %v115_v19 = vpop.f32.mrf.mxu0 }
  0xce   :  { %v123_v20 = vsel %vm122_vm3, %v119_v18, 0.0  ;;  %v116_v21 = vadd.f32 %v453_v14, %v115_v19 }
  0xcf   :  { %v124_v22 = vrot.slane %v123_v20, 4  ;;  %v491_v23 = vpop.f32.mrf.mxu0 }
  0xd0   :  { %v120_v24 = vmax.f32 %v116_v21, 0.0 }
  0xd1   :  { %v125_v25 = vadd.f32 %v124_v22, %v123_v20 }
  0xd2   :  { %v130_v26 = vsel %vm122_vm3, %v120_v24, 0.0 }
  0xd3   :  { %v126_v27 = vrot.slane %v125_v25, 2  ;;  %v131_v28 = vrot.slane %v130_v26, 4 }
  0xd5   :  { %v127_v29 = vadd.f32 %v126_v27, %v125_v25  ;;  %v132_v30 = vadd.f32 %v131_v28, %v130_v26 }
  0xd7   :  { %v133_v31 = vrot.slane %v132_v30, 2  ;;  %v128_v32 = vrot.slane %v127_v29, 1 }
  0xd9   :  { %v134_v33 = vadd.f32 %v133_v31, %v132_v30  ;;  %v129_v35 = vadd.f32 %v128_v32, %v127_v29 }
  0xdb   :  { %v135_v34 = vrot.slane %v134_v33, 1 }
  0xdd   :  { %v136_v37 = vadd.f32 %v135_v34, %v134_v33 }
  0xdf   :  { %v140_v38 = vsel %vm139_vm4, %v136_v37, %v129_v35 }
  0xe0   :  { %v142_v39 = vadd.f32 %v140_v38, %v121_v36 }
  0xe2   :  { %144 = vst.msk [vmem:[#allocation2] sm:$0x3] %vm42_vm2, %v142_v39 }
  0xe9   :  { %v148_v40 = vld [vmem:[#allocation2] sm:$0x3] }
  0xea   :  { %v149_v41 = vmul.f32 0.125, %v148_v40 }
  0xec   :  { %509 = vmatmul.mubr.msk.f32.vlgmr.msra.gmra.mxu1 %vm122_vm3, %v149_v41 }
 0x1ac   :  { %v234_v45 = vpop.f32.mrf.mxu1 }
 0x1ad   :  { %v235_v46 = vadd.f32 %v458_v44, %v234_v45 }
 0x1ae   :  { %v510_v47 = vpop.f32.mrf.mxu1 }
 0x1af   :  { %v238_v48 = vmax.f32 %v235_v46, 0.0 }
 0x1b1   :  { %520 = vmatmul.mubr.msk.f32.vlgmr.msra.gmra.mxu0 %vm74_vm1, %v238_v48  ;;  %408 = vst.msk [vmem:[#allocation3] sm:$0x3] %vm407_vm5, %v238_v48 }
 0x1b2   :  { %526 = vmatprep.mubr.msk.f32.mxu0 %vm602_vm0, %v601_v1  ;;  %523 = vmatpush3.msra.mxu0 %v325_v49 }
 0x1b3   :  { %524 = vmatprep.subr.mxu0 %v601_v1 }
 0x1b4   :  { %525 = vmatpush3.msra.mxu0 %v324_v50 }
 0x271   :  { %v319_v52 = vpop.f32.mrf.mxu0 }
 0x272   :  { %v320_v53 = vadd.f32 %v460_v51, %v319_v52 }
 0x273   :  { %v521_v54 = vpop.f32.mrf.mxu0 }
 0x274   :  { %v323_v55 = vmax.f32 %v320_v53, 0.0 }
 0x276   :  { %527 = vmatmul.mubr.msk.f32.vlgmr.msra.gmra.mxu0 %vm333_vm6, %v323_v55  ;;  %410 = vst.msk [vmem:[#allocation5] sm:$0x3] %vm409_vm7, %v323_v55 }
 0x277   :  { %548 = shalt.err (!%p545_p4)
}
 0x278   :  { %431 = dma.vmem_to_hbm [thread:$0]  %s429_s12, 32, %s782_s10, [#allocation6]  }
 0x279   :  { %s557_s16 = scalar_lea.vmem %s419_s14, 32  ;;  %p562_p6 = scmp.lt.s32.totalorder %s419_s14, %s419_s14 }
 0x27a   :  { %p558_p5 = scmp.ne.s32.totalorder %s419_s14, %s557_s16  ;;  %p563_p7 = scmp.lt.s32.totalorder %s557_s16, %s557_s16 }
 0x27c   :  { %p564_p8 = por %p563_p7, %p562_p6 }
 0x27e   :  { %p565_p9 = pnand %p564_p8, %p558_p5 }
 0x280   :  { %568 = shalt.err (!%p565_p9)
}
 0x281   :  { %421 = dma.vmem_to_hbm [thread:$0]  %s419_s14, 32, %s781_s9, [#allocation4]   ;;  %v462_v56 = vld [vmem:[%s780_s8] ss:$0 sm:$0xff] }
 0x282   :  { %s605_s21 = smov [#allocation7]  }
 0x283   :  { %s438_s22 = sshll.u32 %s605_s21, 4  ;;  %s439_s22 = int_to_ptr.vmem [resolvable:$true] %s438_s22 }
 0x284   :  { %s577_s10 = scalar_lea.vmem %s439_s22, 32  ;;  %p582_p11 = scmp.lt.s32.totalorder %s439_s22, %s439_s22 }
 0x285   :  { %p578_p10 = scmp.ne.s32.totalorder %s439_s22, %s577_s10  ;;  %p583_p12 = scmp.lt.s32.totalorder %s577_s10, %s577_s10 }
 0x287   :  { %p584_p13 = por %p583_p12, %p582_p11 }
 0x289   :  { %p585_p0 = pnand %p584_p13, %p578_p10 }
 0x336   :  { %v403_v57 = vpop.f32.mrf.mxu0 }
 0x337   :  { %v404_v58 = vadd.f32 %v462_v56, %v403_v57 }
 0x338   :  { %v528_v59 = vpop.f32.mrf.mxu0 }
 0x339   :  { %411 = vst.msk [vmem:[#allocation7] sm:$0x3] %vm407_vm5, %v404_v58 }
 0x33a   :  { %588 = shalt.err (!%p585_p0)
}
 0x33b   :  { %441 = dma.vmem_to_hbm [thread:$0]  %s439_s22, 32, %s783_s11, [#allocation6]  }
 0x33c   :  { %597 = dma.done.wait [#allocation4], 32  }
 0x33d   :  { %598 = vsyncadd [#allocation4], 4294967264 }
 0x33e   :  { %599 = dma.done.wait [#allocation6], 64  }
 0x33f   :  { %600 = vsyncadd [#allocation6], 4294967232 }
 0x340   :  { %451 = vsyncpa [#allocation4], 1 }
 0x341   :  { %452 = vsyncpa [#allocation6], 1 }

</bundles_post_ra>
